<compile_context>
chip_gen: v7x
topology: tpu7x:2x2x1
jax: 0.10.0
libtpu: 0.0.40
codegen_flags: <defaults>
</compile_context>

<pallas_src>
import functools
import math

import jax
import jax.numpy as jnp
from jax import lax
from jax.experimental import pallas as pl
from jax.experimental.pallas import tpu as pltpu


# Large finite negative instead of -inf: avoids exp(-inf - (-inf)) NaNs for
# fully-masked tiles / padded rows (online softmax self-corrects with a finite value).
_NEG_INF = -1e30
_VMEM_LIMIT = 64 * 1024 * 1024   # explicit scoped-VMEM cap (re-derive tiles per gen)


# ----------------------------------------------------------------------------
# Tiled projection matmul (wqkv fused projection and wo) — f32 accumulator
# ----------------------------------------------------------------------------
def _matmul_kernel(x_ref, w_ref, o_ref, acc_ref):
    @pl.when(pl.program_id(2) == 0)
    def _init():
        acc_ref[...] = jnp.zeros_like(acc_ref)

    acc_ref[...] += jnp.dot(x_ref[...], w_ref[...],
                            preferred_element_type=jnp.float32)

    @pl.when(pl.program_id(2) == pl.num_programs(2) - 1)
    def _store():
        o_ref[...] = acc_ref[...].astype(o_ref.dtype)


def matmul(x, w, *, out_dtype=None, tm=256, tn=256, tk=512):
    """out = x @ w.  MXU operands in x.dtype (bf16 on fast path), f32 accumulation."""
    M, K = x.shape
    K2, N = w.shape
    assert K == K2
    out_dtype = out_dtype if out_dtype is not None else x.dtype
    tm, tn, tk = min(tm, M), min(tn, N), min(tk, K)
    # TODO(synk): remainder (non-divisible) tiles are not handled.
    assert M % tm == 0 and N % tn == 0 and K % tk == 0, (M, N, K, tm, tn, tk)

    return pl.pallas_call(
        _matmul_kernel,
        out_shape=jax.ShapeDtypeStruct((M, N), out_dtype),
        grid_spec=pltpu.PrefetchScalarGridSpec(
            num_scalar_prefetch=0,
            grid=(M // tm, N // tn, K // tk),
            in_specs=[pl.BlockSpec((tm, tk), lambda i, j, k: (i, k)),
                      pl.BlockSpec((tk, tn), lambda i, j, k: (k, j))],
            out_specs=pl.BlockSpec((tm, tn), lambda i, j, k: (i, j)),
            scratch_shapes=[pltpu.VMEM((tm, tn), jnp.float32)]),
        compiler_params=pltpu.CompilerParams(
            dimension_semantics=("parallel", "parallel", "arbitrary"),
            vmem_limit_bytes=_VMEM_LIMIT),
    )(x, w)


# ----------------------------------------------------------------------------
# Fused RoPE + causal flash attention
# ----------------------------------------------------------------------------
def _rope(x, cos, sin, is_even):
    """Interleaved-pair rotation (torch.view_as_complex semantics), f32 math.

      out[2i]   = x[2i]  *cos[i] - x[2i+1]*sin[i]
      out[2i+1] = x[2i+1]*cos[i] + x[2i]  *sin[i]

    cos/sin already repeated per pair to full head_dim width.  Lane moves go
    through the XLU (pltpu.roll), which does not compete with the MXU/VPU slots.
    """
    d = x.shape[-1]
    x_prev = pltpu.roll(x, shift=1, axis=1)        # value of x[:, j-1] at lane j
    x_next = pltpu.roll(x, shift=d - 1, axis=1)    # value of x[:, j+1] at lane j
    x_rot = jnp.where(is_even, -x_next, x_prev)
    return x * cos + x_rot * sin


def _flash_attn_kernel(q_ref, k_ref, v_ref, cosq_ref, sinq_ref, cosk_ref, sink_ref,
                       o_ref, m_scr, l_scr, acc_scr, *, sm_scale, approx_recip):
    qi = pl.program_id(1)
    ki = pl.program_id(2)
    block_q, n_heads, _ = q_ref.shape
    block_k = k_ref.shape[0]

    @pl.when(ki == 0)
    def _init():
        m_scr[...] = jnp.full_like(m_scr, _NEG_INF)
        l_scr[...] = jnp.zeros_like(l_scr)
        acc_scr[...] = jnp.zeros_like(acc_scr)

    # Skip kv tiles strictly above the causal diagonal — their contribution is zero.
    @pl.when(ki * block_k <= qi * block_q + (block_q - 1))
    def _compute():
        mm_dtype = q_ref.dtype                 # bf16 on fast path, f32 otherwise
        cos_q = cosq_ref[...]                  # (block_q, D) f32
        sin_q = sinq_ref[...]
        cos_k = cosk_ref[...]                  # (block_k, D) f32
        sin_k = sink_ref[...]

        # Hoisted per-tile constants (shared by the head loop).
        even_q = (lax.broadcasted_iota(jnp.int32, cos_q.shape, 1) % 2) == 0
        even_k = (lax.broadcasted_iota(jnp.int32, cos_k.shape, 1) % 2) == 0
        # In-kernel causal mask from iotas — no (S, S) HBM mask tensor.
        row = qi * block_q + lax.broadcasted_iota(jnp.int32, (block_q, block_k), 0)
        col = ki * block_k + lax.broadcasted_iota(jnp.int32, (block_q, block_k), 1)
        causal = row >= col

        for h in range(n_heads):
            q = q_ref[:, h, :].astype(jnp.float32)          # (block_q, D)
            k = k_ref[:, h, :].astype(jnp.float32)          # (block_k, D)

            # RoPE in f32; fold 1/sqrt(D) into q instead of scaling (tq, tk) scores.
            qr = _rope(q, cos_q, sin_q, even_q) * sm_scale
            # TODO(synk): rope(k) is recomputed for every q tile; cache rotated K
            # per (batch, kv-tile) if the kernel becomes VPU/XLU-bound (esp. v5e).
            kr = _rope(k, cos_k, sin_k, even_k)

            # QK^T without an explicit transpose: contract the last dims on the MXU.
            s = lax.dot_general(qr.astype(mm_dtype), kr.astype(mm_dtype),
                                dimension_numbers=(((1,), (1,)), ((), ())),
                                preferred_element_type=jnp.float32)
            s = jnp.where(causal, s, _NEG_INF)

            # Online softmax update (f32 stats).
            m_prev = m_scr[h]                                # (block_q, 1)
            m_new = jnp.maximum(m_prev, jnp.max(s, axis=-1, keepdims=True))
            alpha = jnp.exp(m_prev - m_new)
            p = jnp.exp(s - m_new)
            l_scr[h] = alpha * l_scr[h] + jnp.sum(p, axis=-1, keepdims=True)
            acc_scr[h] = alpha * acc_scr[h] + lax.dot_general(
                p.astype(mm_dtype), v_ref[:, h, :],
                dimension_numbers=(((1,), (0,)), ((), ())),
                preferred_element_type=jnp.float32)
            m_scr[h] = m_new

    @pl.when(ki == pl.num_programs(2) - 1)
    def _finalize():
        for h in range(n_heads):
            inv_l = pl.reciprocal(l_scr[h], approx=approx_recip)   # EUP, not VPU divide
            o_ref[:, h, :] = (acc_scr[h] * inv_l).astype(o_ref.dtype)


def flash_attention(qkv, cos, sin, *, block_q=128, block_k=128, approx_recip=False):
    """Fused RoPE + causal flash attention.

    qkv : (B, S, 3, H, D) fused-projection output; q/k/v and the sequence tile are
          selected purely by BlockSpec index_maps (no transpose copies).
    cos, sin : (S, D) f32 RoPE tables (values repeated per interleaved pair).
    Returns (B, S, H, D) in qkv.dtype — reshapes for free to (B*S, H*D) for wo.
    """
    B, S, three, H, D = qkv.shape
    assert three == 3
    block_q = min(block_q, S)
    block_k = min(block_k, S)
    assert S % block_q == 0 and S % block_k == 0

    grid = (B, S // block_q, S // block_k)
    sm_scale = 1.0 / math.sqrt(D)

    q_spec = pl.BlockSpec((None, block_q, None, H, D), lambda b, i, j: (b, i, 0, 0, 0))
    k_spec = pl.BlockSpec((None, block_k, None, H, D), lambda b, i, j: (b, j, 1, 0, 0))
    v_spec = pl.BlockSpec((None, block_k, None, H, D), lambda b, i, j: (b, j, 2, 0, 0))
    cq_spec = pl.BlockSpec((block_q, D), lambda b, i, j: (i, 0))
    ck_spec = pl.BlockSpec((block_k, D), lambda b, i, j: (j, 0))
    out_spec = pl.BlockSpec((None, block_q, H, D), lambda b, i, j: (b, i, 0, 0))

    return pl.pallas_call(
        functools.partial(_flash_attn_kernel, sm_scale=sm_scale,
                          approx_recip=approx_recip),
        out_shape=jax.ShapeDtypeStruct((B, S, H, D), qkv.dtype),
        grid_spec=pltpu.PrefetchScalarGridSpec(
            num_scalar_prefetch=0,
            grid=grid,
            in_specs=[q_spec, k_spec, v_spec, cq_spec, cq_spec, ck_spec, ck_spec],
            out_specs=out_spec,
            scratch_shapes=[pltpu.VMEM((H, block_q, 1), jnp.float32),    # m
                            pltpu.VMEM((H, block_q, 1), jnp.float32),    # l
                            pltpu.VMEM((H, block_q, D), jnp.float32)]),  # acc
        compiler_params=pltpu.CompilerParams(
            dimension_semantics=("parallel", "parallel", "arbitrary"),
            vmem_limit_bytes=_VMEM_LIMIT),
    )(qkv, qkv, qkv, cos, sin, cos, sin)


# ----------------------------------------------------------------------------
# Full Attention.forward (training path, start_pos = 0, causal mask)
# ----------------------------------------------------------------------------
def llama_attention(x, wq, wk, wv, wo, cos, sin, n_head, *,
                    compute_dtype=jnp.bfloat16,
                    block_q=128, block_k=128,
                    proj_tm=256, proj_tn=256, proj_tk=512):
    B, S, hidden = x.shape
    H = n_head
    D = hidden // H

    # Fuse wq/wk/wv so x is streamed from HBM once (one-time weight re-pack).
    wqkv = jnp.concatenate([wq, wk, wv], axis=1).astype(compute_dtype)   # (hidden, 3*H*D)
    xf = x.reshape(B * S, hidden).astype(compute_dtype)

    qkv = matmul(xf, wqkv, out_dtype=compute_dtype,
                 tm=proj_tm, tn=proj_tn, tk=proj_tk)
    qkv = qkv.reshape(B, S, 3, H, D)        # free row-major reshape; no transposes

    attn = flash_attention(qkv, cos.astype(jnp.float32), sin.astype(jnp.float32),
                           block_q=block_q, block_k=block_k,
                           approx_recip=(compute_dtype == jnp.bfloat16))
    attn = attn.reshape(B * S, H * D)       # (B,S,H,D) layout -> free reshape for wo

    out = matmul(attn, wo.astype(compute_dtype), out_dtype=jnp.float32,
                 tm=proj_tm, tn=proj_tn, tk=proj_tk)
    return out.reshape(B, S, hidden)


# ----------------------------------------------------------------------------
# Pure-JAX reference (real-arithmetic RoPE, matches torch.view_as_complex math)
# ----------------------------------------------------------------------------
def reference(x, wq, wk, wv, wo, cos_half, sin_half, mask, n_head):
    B, S, hidden = x.shape
    D = hidden // n_head

    def proj(w):
        return (x.reshape(B * S, hidden) @ w).reshape(B, S, n_head, D)

    xq, xk, xv = proj(wq), proj(wk), proj(wv)

    def rope(t):
        tr = t.reshape(B, S, n_head, D // 2, 2)
        c = cos_half[None, :, None, :]
        s = sin_half[None, :, None, :]
        r0 = tr[..., 0] * c - tr[..., 1] * s
        r1 = tr[..., 0] * s + tr[..., 1] * c
        return jnp.stack([r0, r1], axis=-1).reshape(B, S, n_head, D)

    q = jnp.transpose(rope(xq), (0, 2, 1, 3))
    k = jnp.transpose(rope(xk), (0, 2, 1, 3))
    v = jnp.transpose(xv, (0, 2, 1, 3))

    scores = jnp.einsum("bhqd,bhkd->bhqk", q, k) / math.sqrt(D) + mask[None, None]
    p = jax.nn.softmax(scores, axis=-1)
    o = jnp.einsum("bhqk,bhkd->bhqd", p, v)
    o = jnp.transpose(o, (0, 2, 1, 3)).reshape(B * S, n_head * D)
    return (o @ wo).reshape(B, S, hidden)


if __name__ == "__main__":
    # Small config: batch=2, seq=16, hidden=32, n_head=4 -> head_dim=8
    # (seq=16 with block 8 exercises multi-tile online softmax + causal tile skip).
    B, S, HIDDEN, N_HEAD = 2, 16, 32, 4
    D = HIDDEN // N_HEAD

    key = jax.random.PRNGKey(0)
    kx, kq, kk, kv, ko = jax.random.split(key, 5)
    wscale = 1.0 / math.sqrt(HIDDEN)
    x = jax.random.normal(kx, (B, S, HIDDEN), dtype=jnp.float32)
    # weights stored as (in_features, out_features)  (i.e. W^T of nn.Linear)
    wq = wscale * jax.random.normal(kq, (HIDDEN, N_HEAD * D), dtype=jnp.float32)
    wk = wscale * jax.random.normal(kk, (HIDDEN, N_HEAD * D), dtype=jnp.float32)
    wv = wscale * jax.random.normal(kv, (HIDDEN, N_HEAD * D), dtype=jnp.float32)
    wo = wscale * jax.random.normal(ko, (N_HEAD * D, HIDDEN), dtype=jnp.float32)

    # freqs_cis (precompute_freqs_cis, theta=10000), represented as cos/sin
    theta = 10000.0
    freqs = 1.0 / (theta ** (jnp.arange(0, D, 2, dtype=jnp.float32) / D))   # (D/2,)
    t = jnp.arange(S, dtype=jnp.float32)
    angles = jnp.outer(t, freqs)                        # (S, D/2)
    cos_half, sin_half = jnp.cos(angles), jnp.sin(angles)
    cos_full = jnp.repeat(cos_half, 2, axis=-1)         # (S, D) interleaved pairs
    sin_full = jnp.repeat(sin_half, 2, axis=-1)

    # reference additive causal mask (start_pos = 0 training path); large finite
    # negative instead of -inf to avoid NaN hazards.
    mask = jnp.where(jnp.triu(jnp.ones((S, S), dtype=bool), k=1),
                     _NEG_INF, 0.0).astype(jnp.float32)

    ref = reference(x, wq, wk, wv, wo, cos_half, sin_half, mask, N_HEAD)

    # 1) f32-operand path: tight numerical check of the kernel structure.
    out_f32 = llama_attention(x, wq, wk, wv, wo, cos_full, sin_full, N_HEAD,
                              compute_dtype=jnp.float32,
                              block_q=8, block_k=8, proj_tm=8)
    out_f32 = jax.block_until_ready(out_f32)
    assert out_f32.shape == (B, S, HIDDEN)
    assert jnp.allclose(out_f32, ref, rtol=1e-3, atol=1e-3), (
        f"f32 path max abs diff {jnp.max(jnp.abs(out_f32 - ref))}")

    # 2) bf16-MXU fast path (f32 accumulation / softmax stats): looser tolerance.
    out_bf16 = llama_attention(x, wq, wk, wv, wo, cos_full, sin_full, N_HEAD,
                               compute_dtype=jnp.bfloat16,
                               block_q=8, block_k=8, proj_tm=8)
    out_bf16 = jax.block_until_ready(out_bf16)
    assert out_bf16.shape == (B, S, HIDDEN)
    assert jnp.allclose(out_bf16, ref, rtol=1e-1, atol=1e-1), (
        f"bf16 path max abs diff {jnp.max(jnp.abs(out_bf16 - ref))}")

    print("KERNEL_OK")
</pallas_src>

<mosaic_0001>
module attributes {stable_mosaic.version = 11 : i64} {
  func.func @_matmul_kernel(%arg0: i32, %arg1: i32, %arg2: i32, %arg3: memref<8x32xf32, #tpu.memory_space<vmem>>, %arg4: memref<32x96xf32, #tpu.memory_space<vmem>>, %arg5: memref<8x96xf32, #tpu.memory_space<vmem>>, %arg6: memref<8x96xf32, #tpu.memory_space<vmem>>) attributes {dimension_semantics = [#tpu.dimension_semantics<parallel>, #tpu.dimension_semantics<parallel>, #tpu.dimension_semantics<arbitrary>], iteration_bounds = array<i64: 4, 1, 1>, scalar_prefetch = 0 : i64, scratch_operands = 1 : i64, tpu.core_type = #tpu.core_type<tc>, window_params = [{transform_indices = @transform_0, window_bounds = array<i64: 8, 32>}, {transform_indices = @transform_1, window_bounds = array<i64: 32, 96>}, {transform_indices = @transform_2, window_bounds = array<i64: 8, 96>}]} {
    %c0_i32 = arith.constant 0 : i32
    %0 = arith.cmpi eq, %arg2, %c0_i32 : i32
    %1 = arith.extui %0 : i1 to i32
    %c0_i32_0 = arith.constant 0 : i32
    %2 = arith.cmpi ne, %1, %c0_i32_0 : i32
    scf.if %2 {
      %cst_10 = arith.constant 0.000000e+00 : f32
      %12 = vector.broadcast %cst_10 : f32 to vector<8x96xf32>
      %c0_11 = arith.constant 0 : index
      %c0_12 = arith.constant 0 : index
      %13 = vector.load %arg6[%c0_11, %c0_12] : memref<8x96xf32, #tpu.memory_space<vmem>>, vector<8x96xf32>
      tpu.vector_store %arg6[%c0_11, %c0_12], %12 {strides = array<i32>} : memref<8x96xf32, #tpu.memory_space<vmem>>, vector<8x96xf32>,
    } else {
    }
    %c0 = arith.constant 0 : index
    %c0_1 = arith.constant 0 : index
    %3 = vector.load %arg6[%c0, %c0_1] : memref<8x96xf32, #tpu.memory_space<vmem>>, vector<8x96xf32>
    %c0_2 = arith.constant 0 : index
    %c0_3 = arith.constant 0 : index
    %4 = vector.load %arg3[%c0_2, %c0_3] : memref<8x32xf32, #tpu.memory_space<vmem>>, vector<8x32xf32>
    %c0_4 = arith.constant 0 : index
    %c0_5 = arith.constant 0 : index
    %5 = vector.load %arg4[%c0_4, %c0_5] : memref<32x96xf32, #tpu.memory_space<vmem>>, vector<32x96xf32>
    %cst = arith.constant dense<0.000000e+00> : vector<8x96xf32>
    %6 = tpu.matmul %4, %5, %cst {dimension_numbers = #tpu.dot_dimension_numbers<[1], [0], [0], [1], [0, 0, 1, 1], [], []>} : vector<8x32xf32>, vector<32x96xf32>, vector<8x96xf32> -> vector<8x96xf32>
    %7 = arith.addf %3, %6 : vector<8x96xf32>
    %c0_6 = arith.constant 0 : index
    %c0_7 = arith.constant 0 : index
    %8 = vector.load %arg6[%c0_6, %c0_7] : memref<8x96xf32, #tpu.memory_space<vmem>>, vector<8x96xf32>
    tpu.vector_store %arg6[%c0_6, %c0_7], %7 {strides = array<i32>} : memref<8x96xf32, #tpu.memory_space<vmem>>, vector<8x96xf32>,
    %c0_i32_8 = arith.constant 0 : i32
    %9 = arith.cmpi eq, %arg2, %c0_i32_8 : i32
    %10 = arith.extui %9 : i1 to i32
    %c0_i32_9 = arith.constant 0 : i32
    %11 = arith.cmpi ne, %10, %c0_i32_9 : i32
    scf.if %11 {
      %c0_10 = arith.constant 0 : index
      %c0_11 = arith.constant 0 : index
      %12 = vector.load %arg6[%c0_10, %c0_11] : memref<8x96xf32, #tpu.memory_space<vmem>>, vector<8x96xf32>
      %c0_12 = arith.constant 0 : index
      %c0_13 = arith.constant 0 : index
      %13 = vector.load %arg5[%c0_12, %c0_13] : memref<8x96xf32, #tpu.memory_space<vmem>>, vector<8x96xf32>
      tpu.vector_store %arg5[%c0_12, %c0_13], %12 {strides = array<i32>} : memref<8x96xf32, #tpu.memory_space<vmem>>, vector<8x96xf32>,
    } else {
    }
    return
  }
  func.func @transform_0(%arg0: i32, %arg1: i32, %arg2: i32) -> (i32, i32) {
    %c0_i32 = arith.constant 0 : i32
    return %arg0, %arg2 : i32, i32
  }
  func.func @transform_1(%arg0: i32, %arg1: i32, %arg2: i32) -> (i32, i32) {
    %c0_i32 = arith.constant 0 : i32
    return %arg2, %arg1 : i32, i32
  }
  func.func @transform_2(%arg0: i32, %arg1: i32, %arg2: i32) -> (i32, i32) {
    %c0_i32 = arith.constant 0 : i32
    return %arg0, %arg1 : i32, i32
  }
}

</mosaic_0001>

<bundles_post_ra>
// kernel: tpu_custom_call.1
= control target key start
LH: loop header
LB: loop body
LE: loop exit
PB: predicated region body
PF: predicated region fallthrough
CT: control target
= control target key end

     0   :  { %7 = vsyncpa [#allocation4], 0  ;;  %s920_s0 = inlined_call_operand.hbm [shape: f32[32,32], index: 0, kind: input, shape index: {}]   ;;  %s921_s1 = inlined_call_operand.hbm [shape: f32[32,96], index: 1, kind: input, shape index: {}]   ;;  %s922_s2 = inlined_call_operand.hbm [shape: f32[32,96], index: 2, kind: output, shape index: {}]  }
   0x1   :  { %9 = vsyncpa [#allocation4 + $0x1], 0 }
   0x2   :  { %10 = vsyncpa [#allocation7], 0 }
   0x3   :  { %11 = vsyncpa [#allocation5], 0 }
   0x4   :  { %13 = vsyncpa [#allocation5 + $0x1], 0  ;;  %s701_s9 = smov 0   ;;  %s703_s10 = smov 0  }
   0x5   :  { %s705_s11 = smov 0   ;;  %s707_s12 = smov 0  }
   0x6   :  { %s709_s13 = smov 0   ;;  %s711_s14 = smov 0  }
   0x7 LB: > { %s416_s15 = sadd.s32 4294967295, %s676_s14   ;;  %s417_s16 = sadd.s32 4294967294, %s676_s14   ;;  %s676_s14 = sphi %s711_s14, %s19_s14   ;;  %s672_s13 = sphi %s709_s13, %s945_s13   ;;  %s668_s12 = sphi %s707_s12, %s944_s12   ;;  %s664_s11 = sphi %s705_s11, %s943_s11   ;;  %s660_s10 = sphi %s703_s10, %s942_s10   ;;  %s656_s9 = sphi %s701_s9, %s941_s9  }
   0x8   : > { %p60_p0 = scmp.ne.s32.totalorder %s660_s10, %s656_s9  ;;  %p735_p1 = scmp.eq.s32.totalorder %s416_s15, 0 }
   0x9   : > { %p739_p2 = scmp.eq.s32.totalorder %s416_s15, 3  ;;  %p120_p3 = scmp.eq.s32.totalorder %s417_s16, 3 }
   0xa   : > { %s927_s17 = scalar_select %p735_p1, 1, 0 }
   0xb   : > { %s928_s18 = scalar_select %p739_p2, 1, 0 }
   0xc   : > { %p745_p4 = por %p735_p1, %p60_p0  ;;  %p418_p5 = scmp.ge.s32.totalorder %s676_s14, 1 }
   0xd   : > { %p750_p6 = por %p120_p3, %p60_p0  ;;  %p127_p7 = scmp.lt.s32.totalorder %s676_s14, 5 }
   0xe   : > { %s929_s19 = scalar_select %p745_p4, 1, 0 }
   0xf   : > { %s930_s20 = scalar_select %p750_p6, 1, 0 }
  0x10   : > { %p755_p8 = pnand %p418_p5, %p127_p7  ;;  %s678_s22 = smov [#allocation6]  }
  0x11   : > { %s143_s23 = sshll.u32 %s678_s22, 4  ;;  %s38_s25 = sadd.s32 1, %s672_s13  ;;  %s144_s23 = int_to_ptr.vmem [resolvable:$true] %s143_s23 }
  0x12   : > { %s931_s21 = scalar_select %p755_p8, 1, 0 }
  0x13   : > { %p462_p9 = pneg %p755_p8  ;;  %s532_s28 = scalar_lea.hbm %s921_s1, 512 }
  0x14   : > { %p533_p11 = scmp.ne.s32.totalorder %s921_s1, %s532_s28  ;;  %p539_p3 = scmp.lt.u32.totalorder %s532_s28, %s921_s1 }
  0x15   : > { %p763_p10 = pnand %p462_p9, %p735_p1 }
  0x17   : > { %p534_p12 = pneg %p763_p10 }
  0x19   : > { %p535_p13 = pnand %p534_p12, %p533_p11 }
  0x1b   : > { %p536_p0 = pneg %p535_p13 }
  0x1d   : > { %p541_p5 = pnand %p539_p3, %p536_p0 }
  0x1f   : > { %544 = shalt.err (!%p541_p5)
}
  0x20   : > { %s545_s5 = scalar_lea.vmem %s144_s23, 512  ;;  %p553_p1 = scmp.lt.s32.totalorder %s144_s23, %s144_s23 }
  0x21   : > { %p546_p7 = scmp.ne.s32.totalorder %s144_s23, %s545_s5  ;;  %p554_p4 = scmp.lt.s32.totalorder %s545_s5, %s545_s5 }
  0x23   : > { %p548_p9 = pnand %p546_p7, %p534_p12  ;;  %p555_p8 = por %p554_p4, %p553_p1 }
  0x25   : > { %p549_p6 = pneg %p548_p9 }
  0x27   : > { %p556_p2 = pnand %p555_p8, %p549_p6 }
  0x29   : > { %559 = shalt.err (!%p556_p2)
}
  0x2a   : > { %s679_s6 = smov 128   ;;  %s680_s7 = smov 8  }
  0x2b   : > { %465 = dma.hbm_to_vmem [thread:$0]  (!%p763_p10), %s921_s1, 512, %s144_s23, [#allocation7], %s679_s6, %s679_s6, %s680_s7  }
  0x2c   : > { %p40_p1 = scmp.ge.s32.totalorder %s38_s25, 4  ;;  %s47_s16 = sadd.s32 1, %s664_s11 }
  0x2d   : > { %p54_p2 = scmp.ne.s32.totalorder %s664_s11, %s660_s10  ;;  %p55_p4 = scmp.eq.s32.totalorder %s676_s14, 0 }
  0x2e   : > { %s947_s25 = smov (%p40_p1, %s38_s25), 0  ;;  %p934_p8 = scmp.ne.s32.totalorder %s928_s18, 0 }
  0x2f   : > { %p790_p6 = por %p55_p4, %p54_p2  ;;  %s42_s24 = ssub.s32 %s672_s13, %s947_s25 }
  0x30   : > { %p796_p11 = por %p934_p8, %p54_p2  ;;  %p475_p12 = scmp.lt.s32.totalorder %s676_s14, 4 }
  0x31   : > { %p45_p10 = scmp.eq.s32.totalorder %s42_s24, 0  ;;  %s157_s23 = sand.u32 1, %s664_s11  }
  0x32   : > { %s421_s27 = sshll.u32 %s157_s23, 3  ;;  %s422_s29 = sshll.u32 %s672_s13, 7 }
  0x33   : > { %s805_s28 = scalar_select %p45_p10, %s664_s11, %s47_s16  }
  0x34   : > { %s811_s4 = scalar_lea.hbm %s920_s0, %s422_s29  ;;  %s161_s18 = scalar_lea.vmem [#allocation3], %s421_s27 }
  0x35   : > { %s169_s5 = sshll.u32 %s161_s18, 4  ;;  %p817_p13 = pnand %p475_p12, %p790_p6  ;;  %s813_s5 = int_to_ptr.vmem [resolvable:$true] %s169_s5 }
  0x36   : > { %s158_s7 = scalar_lea.sflag [#allocation4], %s157_s23  ;;  %s560_s8 = scalar_lea.hbm %s811_s4, 128 }
  0x37   : > { %p561_p0 = scmp.ne.s32.totalorder %s811_s4, %s560_s8  ;;  %p562_p3 = pneg %p817_p13 }
  0x38   : > { %s565_s24 = scalar_lea.hbm %s920_s0, 512  ;;  %p566_p9 = scmp.lt.u32.totalorder %s811_s4, %s920_s0 }
  0x39   : > { %p563_p5 = pnand %p562_p3, %p561_p0  ;;  %p567_p1 = scmp.lt.u32.totalorder %s565_s24, %s560_s8 }
  0x3a   : > { %p569_p4 = scmp.lt.u32.totalorder %s560_s8, %s811_s4 }
  0x3b   : > { %p564_p7 = pneg %p563_p5  ;;  %p568_p2 = por %p567_p1, %p566_p9 }
  0x3d   : > { %p570_p6 = por %p569_p4, %p568_p2 }
  0x3f   : > { %p571_p8 = pnand %p570_p6, %p564_p7 }
  0x41   : > { %574 = shalt.err (!%p571_p8)
}
  0x42   : > { %s575_s23 = scalar_lea.vmem %s813_s5, 128  ;;  %s681_s29 = smov [#allocation3]  }
  0x43   : > { %p576_p12 = scmp.ne.s32.totalorder %s813_s5, %s575_s23  ;;  %s580_s30 = sshll.u32 %s681_s29, 4  ;;  %s581_s30 = int_to_ptr.vmem [resolvable:$false] %s580_s30 }
  0x44   : > { %s582_s3 = scalar_lea.vmem %s581_s30, 256  ;;  %p583_p5 = scmp.lt.s32.totalorder %s813_s5, %s581_s30 }
  0x45   : > { %p578_p10 = pnand %p576_p12, %p562_p3  ;;  %p584_p9 = scmp.lt.s32.totalorder %s582_s3, %s575_s23 }
  0x47   : > { %p579_p0 = pneg %p578_p10  ;;  %p585_p1 = por %p584_p9, %p583_p5 }
  0x49   : > { %p586_p2 = pnand %p585_p1, %p579_p0 }
  0x4b   : > { %589 = shalt.err (!%p586_p2)
}
  0x4c   : > { %469 = dma.hbm_to_vmem [thread:$0]  (!%p817_p13), %s811_s4, 128, %s813_s5, %s158_s7  }
  0x4d   : > { %p937_p7 = scmp.ne.s32.totalorder %s931_s21, 0 }
  0x4e   : > { %s849_s18 = sand.u32 (!%p937_p7), 1, %s660_s10   ;;  %p938_p3 = scmp.ne.s32.totalorder (!%p937_p7), %s929_s19, 0 }
  0x4f   : > { %178 = sbr.rel (%p937_p7) target bundleno = 337 (0x151), region = 28  ;;  %s424_s8 = sshll.u32 (!%p937_p7), %s849_s18, 3 }
  0x50   : > { %s181_s15 = scalar_lea.sflag (!%p937_p7), [#allocation4], %s849_s18  ;;  %s184_s16 = scalar_lea.vmem (!%p937_p7), [#allocation3], %s424_s8 }
  0x56   : > { %643 = dma.done.wait (%p938_p3), %s181_s15, 128  }
  0x57   : > { %645 = vsyncadd (%p938_p3), %s181_s15, 4294967168  ;;  %p939_p13 = scmp.ne.s32.totalorder %s927_s17, 0 }
  0x59   : > { %647 = dma.done.wait (%p939_p13), [#allocation7], 512  }
  0x5a   : > { %649 = vsyncadd (%p939_p13), [#allocation7], 4294966784  ;;  %vm214_vm0 = vcmask 785408   ;;  %v682_v0 = vmov 0.0|0.0   ;;  %v683_v1 = vmov 0.0   ;;  %vm684_vm1 = vmmov 0  }
  0x5b   : > { %448 = vmatprep.subr.bf16.mxu0 %v682_v0  ;;  %215 = vst.msk [vmem:[#allocation2] sm:$0xff] %vm214_vm0, %v683_v1  ;;  %445 = vmatprep.mubr.msk.f32.mxu0 %vm684_vm1, %v683_v1  ;;  %v218_v2 = vld [vmem:[#allocation6] sm:$0xff]  ;;  %v219_v3 = vld [vmem:[#allocation6 + $0x8] sm:$0xff]  ;;  %v220_v4 = vld [vmem:[#allocation6 + $0x10] sm:$0xff]  ;;  %vm222_vm2 = vcmask 261120   ;;  %s429_s17 = sshll.u32 %s668_s12, 7 }
  0x5c   : > { %v449_v5 = vpack.c.bf16 %v219_v3, %v218_v2  ;;  %v221_v6 = vld [vmem:[#allocation6 + $0x18] sm:$0xff]  ;;  %s208_s19 = scalar_lea.vmem [#allocation8], %s424_s8  ;;  %s871_s6 = scalar_lea.hbm %s922_s2, %s429_s17 }
  0x5d   : > { %v452_v7 = vpack.c.bf16 %v221_v6, %v220_v4  ;;  %v217_v8 = vld [vmem:[%s184_s16] sm:$0xff]  ;;  %s319_s21 = sshll.u32 %s208_s19, 4  ;;  %s305_s7 = scalar_lea.sflag [#allocation5], %s849_s18  ;;  %s873_s21 = int_to_ptr.vmem [resolvable:$true] %s319_s21 }
  0x5e   : > { %450 = vmatpush3.bf16.msra.mxu0 %v449_v5  ;;  %s590_s24 = scalar_lea.vmem %s873_s21, 128  ;;  %s685_s12 = smov [#allocation8]  }
  0x5f   : > { %451 = vmatprep.subr.bf16.mxu0 %v682_v0  ;;  %p591_p4 = scmp.ne.s32.totalorder %s873_s21, %s590_s24  ;;  %s594_s22 = sshll.u32 %s685_s12, 4  ;;  %s595_s22 = int_to_ptr.vmem [resolvable:$false] %s594_s22 }
  0x60   : > { %s596_s27 = scalar_lea.vmem %s595_s22, 256  ;;  %p597_p12 = scmp.lt.s32.totalorder %s873_s21, %s595_s22 }
  0x61   : > { %p592_p6 = pnand %p591_p4, %p796_p11  ;;  %p598_p10 = scmp.lt.s32.totalorder %s596_s27, %s590_s24 }
  0x62   : > { %453 = vmatpush3.bf16.msra.mxu0 %v452_v7  ;;  %v216_v9 = vld [vmem:[#allocation2] sm:$0xff] }
  0x63   : > { %p593_p8 = pneg %p592_p6  ;;  %p599_p0 = por %p598_p10, %p597_p12 }
  0x65   : > { %446 = vmatmul.mubr.msk.f32.vlgmr.msra.gmra.mrb[0].mxu0 %vm222_vm2, %v217_v8  ;;  %p600_p5 = pnand %p599_p0, %p593_p8 }
 0x138   : > { %v292_v10 = vpop.f32.mrb[0].mxu0 }
 0x139   : > { %v296_v11 = vadd.f32 %v292_v10, %v216_v9  ;;  %v447_v12 = vpop.f32.mrb[1].mxu0 }
 0x13b   : > { %298 = vst.msk [vmem:[#allocation2] sm:$0xff] %vm214_vm0, %v296_v11 }
 0x142   : > { %v302_v13 = vld [vmem:[#allocation2] sm:$0xff] }
 0x143   : > { %303 = vst.msk [vmem:[%s208_s19] sm:$0xff] %vm214_vm0, %v302_v13 }
 0x144   : > { %603 = shalt.err (!%p600_p5)
}
 0x145   : > { %s604_s23 = scalar_lea.hbm %s871_s6, 128  ;;  %s608_s3 = scalar_lea.hbm %s922_s2, 512 }
 0x146   : > { %p605_p9 = scmp.ne.s32.totalorder %s871_s6, %s604_s23  ;;  %p609_p7 = scmp.lt.u32.totalorder %s871_s6, %s922_s2 }
 0x147   : > { %p610_p3 = scmp.lt.u32.totalorder %s608_s3, %s604_s23  ;;  %p612_p4 = scmp.lt.u32.totalorder %s604_s23, %s871_s6 }
 0x148   : > { %p606_p1 = pnand %p605_p9, %p796_p11 }
 0x149   : > { %p611_p13 = por %p610_p3, %p609_p7 }
 0x14a   : > { %p607_p2 = pneg %p606_p1 }
 0x14b   : > { %p613_p6 = por %p612_p4, %p611_p13 }
 0x14d   : > { %p614_p8 = pnand %p613_p6, %p607_p2 }
 0x14f   : > { %617 = shalt.err (!%p614_p8)
}
 0x150   : > { %460 = dma.vmem_to_hbm [thread:$0]  (%p796_p11), %s873_s21, 128, %s871_s6, %s305_s7  }
 0x151 PF: > { %p477_p12 = scmp.ge.s32.totalorder %s676_s14, 2  ;;  %s331_s15 = sand.u32 1, %s656_s9  }
 0x152   : > { %p940_p10 = scmp.ne.s32.totalorder %s930_s20, 0  ;;  %s332_s16 = scalar_lea.sflag [#allocation5], %s331_s15 }
 0x154   : > { %p471_p0 = pnand %p477_p12, %p940_p10 }
 0x156   : > { %651 = dma.done.wait (!%p471_p0), %s332_s16, 128  }
 0x157   : > { %653 = vsyncadd (!%p471_p0), %s332_s16, 4294967168  ;;  %s19_s14 = sadd.s32 1, %s676_s14   ;;  %s941_s9 = smov %s660_s10 }
 0x158   : > { %p16_p5 = scmp.ge.s32.totalorder %s19_s14, 6   ;;  %s942_s10 = smov %s664_s11 }
 0x159   : > { %s943_s11 = smov %s805_s28  ;;  %s944_s12 = smov %s672_s13 }
 0x15a   : > { %s945_s13 = smov %s947_s25  ;;  %18 = sbr.rel (!%p16_p5) target bundleno = 7 (0x7), region = 86 }
 0x161   :  { %337 = vsyncpa [#allocation4], 1 }
 0x162   :  { %339 = vsyncpa [#allocation4 + $0x1], 1 }
 0x163   :  { %340 = vsyncpa [#allocation7], 1 }
 0x164   :  { %341 = vsyncpa [#allocation5], 1 }
 0x165   :  { %343 = vsyncpa [#allocation5 + $0x1], 1 }

</bundles_post_ra>
